<compile_context>
chip_gen: v7x
topology: tpu7x:2x2x1
jax: 0.10.0
libtpu: 0.0.40
codegen_flags: <defaults>
</compile_context>

<pallas_src>
import jax
import jax.numpy as jnp
import numpy as np
from jax.experimental import pallas as pl
from jax.experimental.pallas import tpu as pltpu


def _round_up(x, m):
    return ((x + m - 1) // m) * m


def _device_kind():
    try:
        return jax.devices()[0].device_kind.lower()
    except Exception:
        return ""


# ---------------------------------------------------------------------------
# Kernel 1: fc1 (x @ W + b) for both views, K-tiled (+ optional H tiling).
# ---------------------------------------------------------------------------
def fc1_kernel(x1_ref, x2_ref, w_ref, b_ref, l_ref, e_ref):
    """Grid: (num_n, num_k); n tiles fc1 output columns ("parallel"),
    k tiles the contraction dim ("arbitrary", innermost).

    x1_ref/x2_ref : VMEM (Bp, tk)  bf16 K-slices of the two flattened views
    w_ref         : VMEM (tk, tn)  bf16 fc1 weight tile ([D, H] layout)
    b_ref         : VMEM (1, tn)   f32 fc1 bias tile
    l_ref/e_ref   : VMEM (Bp, tn)  f32 fc1 outputs, resident across k (accumulators)
    """
    k = pl.program_id(1)

    @pl.when(k == 0)
    def _init():
        l_ref[...] = jnp.zeros_like(l_ref)
        e_ref[...] = jnp.zeros_like(e_ref)

    # bf16 x bf16 -> f32 partial products on the MXU; W streams from HBM once.
    l_ref[...] += jnp.dot(x1_ref[...], w_ref[...],
                          preferred_element_type=jnp.float32)
    e_ref[...] += jnp.dot(x2_ref[...], w_ref[...],
                          preferred_element_type=jnp.float32)

    @pl.when(k == pl.num_programs(1) - 1)
    def _add_bias():
        l_ref[...] += b_ref[...]
        e_ref[...] += b_ref[...]


# ---------------------------------------------------------------------------
# Kernel 2: L2-normalize both feature blocks + scaled similarity logits.
# ---------------------------------------------------------------------------
def logits_kernel(scale_ref, l_ref, e_ref, out_ref):
    """scale_ref : SMEM (1,)     logit_scale parameter (pre-exp)
    l_ref     : VMEM (Bp, H)  f32 fc1(local)
    e_ref     : VMEM (Bp, H)  f32 fc1(external)
    out_ref   : VMEM (Bp, Bp) local_logits (batch-padded); external = out.T
    """
    tiny = jnp.finfo(jnp.float32).tiny
    l = l_ref[...]
    e = e_ref[...]
    # rsqrt -> EUP slot (no VPU divide).  The tiny clamp only affects
    # exactly-zero-norm rows (padded/degenerate); real rows are untouched.
    l_n = l * jax.lax.rsqrt(jnp.maximum(jnp.sum(l * l, axis=1, keepdims=True), tiny))
    e_n = e * jax.lax.rsqrt(jnp.maximum(jnp.sum(e * e, axis=1, keepdims=True), tiny))
    l_s = l_n * jnp.exp(scale_ref[0])
    # A @ B.T expressed as a last-dim contraction: pure MXU, no XLU transpose.
    out_ref[...] = jax.lax.dot_general(
        l_s, e_n, (((1,), (1,)), ((), ())), preferred_element_type=jnp.float32)


def simple_model_forward(local_hidden, external_hidden, w_fc1, b_fc1,
                         logit_scale, *, tk=None):
    """local_hidden / external_hidden: [B, S, E]; returns (local_logits, external_logits)."""
    B = local_hidden.shape[0]
    D, H = w_fc1.shape

    kind = _device_kind()

    # v7x has 2 TensorCores/chip: split the fc1 output columns across a
    # "parallel" grid axis (each core streams half of W's columns; total W HBM
    # traffic stays 1x).  Single-TC chips (v5e/v6e) keep tn = H.
    num_tc = 2 if "v7" in kind else 1
    tn = H
    if num_tc > 1 and H % num_tc == 0 and (H // num_tc) % 128 == 0:
        tn = H // num_tc
    num_n = H // tn

    # Lane-dense logit outputs for production batches; tiny batches only need
    # sublane (8) padding -- the (Bp, Bp) block is negligible either way.
    Bp = _round_up(B, 128) if B >= 64 else _round_up(max(B, 8), 8)
    pad_b = Bp - B

    # Pad the contraction dim to a multiple of 128 (zero rows of W / zero
    # columns of x are math-preserving) so K tiles always satisfy the (8,128)
    # block constraint regardless of D.
    Dp = _round_up(D, 128)
    pad_d = Dp - D

    # Glue (torch `.view(B, -1)`): flatten seq x embed; cast to bf16 *before*
    # padding, keep the two views separate (no concat -> no extra HBM pass).
    x1 = jnp.pad(local_hidden.reshape(B, -1).astype(jnp.bfloat16),
                 ((0, pad_b), (0, pad_d)))
    x2 = jnp.pad(external_hidden.reshape(B, -1).astype(jnp.bfloat16),
                 ((0, pad_b), (0, pad_d)))
    w = jnp.pad(w_fc1.astype(jnp.bfloat16), ((0, pad_d), (0, 0)))   # (Dp, H)
    b = b_fc1.reshape(1, H).astype(jnp.float32)
    scale = logit_scale.reshape(1).astype(jnp.float32)

    # K-tile budget: stay under the default scoped VMEM limit
    # (16 MiB on v5e, 32 MiB on v6e/v7x), with headroom.
    budget = (12 << 20) if ("v5" in kind) else (24 << 20)

    def fits(t):
        w_dbuf = 2 * t * tn * 2           # weight tile, double-buffered, bf16
        x_dbuf = 2 * 2 * Bp * t * 2       # x1 + x2 tiles, double-buffered, bf16
        outs = 2 * 2 * Bp * tn * 4        # two resident f32 outputs (conservative)
        bias = 2 * tn * 4
        return (w_dbuf + x_dbuf + outs + bias) <= budget

    if tk is None:
        # Largest MXU-friendly divisor of Dp (multiples of 256, 128 as last
        # resort) that fits the VMEM budget.  Never falls back to tk = D.
        tk = 0
        for cand in (2048, 1024, 512, 256, 128):
            if Dp % cand == 0 and fits(cand):
                tk = cand
                break
        if tk == 0:
            tk = 128
            for t in range(256, min(Dp, 2048) + 1, 128):
                if Dp % t == 0 and fits(t):
                    tk = t
    assert Dp % tk == 0 and H % tn == 0, "tile sizes must divide padded dims"
    num_k = Dp // tk

    cost = pl.CostEstimate(
        flops=2 * (2 * Bp) * Dp * H,
        transcendentals=0,
        bytes_accessed=int(w.size) * 2
        + num_n * (int(x1.size) + int(x2.size)) * 2
        + int(b.size) * 4 + 2 * Bp * H * 4,
    )

    feats_l, feats_e = pl.pallas_call(
        fc1_kernel,
        out_shape=(
            jax.ShapeDtypeStruct((Bp, H), jnp.float32),
            jax.ShapeDtypeStruct((Bp, H), jnp.float32),
        ),
        grid=(num_n, num_k),
        in_specs=[
            pl.BlockSpec((Bp, tk), lambda n, k: (0, k)),   # local view K-slice
            pl.BlockSpec((Bp, tk), lambda n, k: (0, k)),   # external view K-slice
            pl.BlockSpec((tk, tn), lambda n, k: (k, n)),   # fc1 weight tile
            pl.BlockSpec((1, tn), lambda n, k: (0, n)),    # fc1 bias tile
        ],
        out_specs=(
            pl.BlockSpec((Bp, tn), lambda n, k: (0, n)),
            pl.BlockSpec((Bp, tn), lambda n, k: (0, n)),
        ),
        compiler_params=pltpu.CompilerParams(
            dimension_semantics=("parallel", "arbitrary"),
        ),
        cost_estimate=cost,
    )(x1, x2, w, b)

    ll_pad = pl.pallas_call(
        logits_kernel,
        out_shape=jax.ShapeDtypeStruct((Bp, Bp), jnp.float32),
        in_specs=[
            pl.BlockSpec(memory_space=pltpu.MemorySpace.SMEM),   # logit_scale
            pl.BlockSpec(memory_space=pltpu.MemorySpace.VMEM),
            pl.BlockSpec(memory_space=pltpu.MemorySpace.VMEM),
        ],
        out_specs=pl.BlockSpec(memory_space=pltpu.MemorySpace.VMEM),
    )(scale, feats_l, feats_e)

    local_logits = ll_pad[:B, :B]
    # torch: external_logits = local_logits.t() -- exact transpose, no extra matmul.
    return local_logits, local_logits.T


if __name__ == "__main__":
    # Small stand-in shapes: torch fc1 = Linear(embed_dim * 512, hidden_dim);
    # here seq=8 stands in for 512 and hidden=128 for 1024.
    B, SEQ, EMBED, HIDDEN = 2, 8, 32, 128
    D = SEQ * EMBED

    key = jax.random.PRNGKey(0)
    k1, k2, k3, k4 = jax.random.split(key, 4)

    # Deterministic stand-ins for the (frozen) GPT2 encoder outputs.
    local_hidden = jax.random.normal(k1, (B, SEQ, EMBED), dtype=jnp.float32)
    external_hidden = jax.random.normal(k2, (B, SEQ, EMBED), dtype=jnp.float32)

    # fc1 parameters stored as [D, H] so the kernel computes x @ W + b.
    w_fc1 = jax.random.normal(k3, (D, HIDDEN), dtype=jnp.float32) * 0.02
    b_fc1 = jax.random.normal(k4, (1, HIDDEN), dtype=jnp.float32) * 0.01

    # logit_scale parameter: ones([]) * log(1/0.07), passed pre-exp like torch.
    logit_scale = jnp.array([np.log(1.0 / 0.07)], dtype=jnp.float32)

    # tk=128 so the toy D=256 exercises the K-tiled accumulator pipeline.
    local_logits, external_logits = simple_model_forward(
        local_hidden, external_hidden, w_fc1, b_fc1, logit_scale, tk=128)
    jax.block_until_ready((local_logits, external_logits))

    # Pure-JAX reference (mirrors the kernel's bf16 cast of x / W for fc1).
    pH = jax.lax.Precision.HIGHEST
    x1 = local_hidden.reshape(B, -1)
    x2 = external_hidden.reshape(B, -1)
    x1b = x1.astype(jnp.bfloat16).astype(jnp.float32)
    x2b = x2.astype(jnp.bfloat16).astype(jnp.float32)
    wb = w_fc1.astype(jnp.bfloat16).astype(jnp.float32)
    l = jnp.matmul(x1b, wb, precision=pH) + b_fc1
    e = jnp.matmul(x2b, wb, precision=pH) + b_fc1
    l_n = l / jnp.linalg.norm(l, axis=1, keepdims=True)
    e_n = e / jnp.linalg.norm(e, axis=1, keepdims=True)
    ref = jnp.exp(logit_scale[0]) * jnp.matmul(l_n, e_n.T, precision=pH)

    np.testing.assert_allclose(np.asarray(local_logits), np.asarray(ref),
                               rtol=1e-3, atol=1e-3)
    np.testing.assert_allclose(np.asarray(external_logits), np.asarray(ref).T,
                               rtol=1e-3, atol=1e-3)

    print("KERNEL_OK")
</pallas_src>

<mosaic_0001>
module attributes {stable_mosaic.version = 11 : i64} {
  func.func @fc1_kernel(%arg0: i32, %arg1: i32, %arg2: memref<8x128xbf16, #tpu.memory_space<vmem>>, %arg3: memref<8x128xbf16, #tpu.memory_space<vmem>>, %arg4: memref<128x128xbf16, #tpu.memory_space<vmem>>, %arg5: memref<1x128xf32, #tpu.memory_space<vmem>>, %arg6: memref<8x128xf32, #tpu.memory_space<vmem>>, %arg7: memref<8x128xf32, #tpu.memory_space<vmem>>) attributes {dimension_semantics = [#tpu.dimension_semantics<parallel>, #tpu.dimension_semantics<arbitrary>], iteration_bounds = array<i64: 1, 2>, scalar_prefetch = 0 : i64, scratch_operands = 0 : i64, tpu.core_type = #tpu.core_type<tc>, window_params = [{transform_indices = @transform_0, window_bounds = array<i64: 8, 128>}, {transform_indices = @transform_1, window_bounds = array<i64: 8, 128>}, {transform_indices = @transform_2, window_bounds = array<i64: 128, 128>}, {transform_indices = @transform_3, window_bounds = array<i64: 1, 128>}, {transform_indices = @transform_4, window_bounds = array<i64: 8, 128>}, {transform_indices = @transform_5, window_bounds = array<i64: 8, 128>}]} {
    %c0_i32 = arith.constant 0 : i32
    %0 = arith.cmpi eq, %arg1, %c0_i32 : i32
    %1 = arith.extui %0 : i1 to i32
    %c0_i32_0 = arith.constant 0 : i32
    %2 = arith.cmpi ne, %1, %c0_i32_0 : i32
    scf.if %2 {
      %cst_18 = arith.constant 0.000000e+00 : f32
      %18 = vector.broadcast %cst_18 : f32 to vector<8x128xf32>
      %c0_19 = arith.constant 0 : index
      %c0_20 = arith.constant 0 : index
      %19 = vector.load %arg6[%c0_19, %c0_20] : memref<8x128xf32, #tpu.memory_space<vmem>>, vector<8x128xf32>
      tpu.vector_store %arg6[%c0_19, %c0_20], %18 {strides = array<i32>} : memref<8x128xf32, #tpu.memory_space<vmem>>, vector<8x128xf32>,
      %cst_21 = arith.constant 0.000000e+00 : f32
      %20 = vector.broadcast %cst_21 : f32 to vector<8x128xf32>
      %c0_22 = arith.constant 0 : index
      %c0_23 = arith.constant 0 : index
      %21 = vector.load %arg7[%c0_22, %c0_23] : memref<8x128xf32, #tpu.memory_space<vmem>>, vector<8x128xf32>
      tpu.vector_store %arg7[%c0_22, %c0_23], %20 {strides = array<i32>} : memref<8x128xf32, #tpu.memory_space<vmem>>, vector<8x128xf32>,
    } else {
    }
    %c0 = arith.constant 0 : index
    %c0_1 = arith.constant 0 : index
    %3 = vector.load %arg6[%c0, %c0_1] : memref<8x128xf32, #tpu.memory_space<vmem>>, vector<8x128xf32>
    %c0_2 = arith.constant 0 : index
    %c0_3 = arith.constant 0 : index
    %4 = vector.load %arg2[%c0_2, %c0_3] : memref<8x128xbf16, #tpu.memory_space<vmem>>, vector<8x128xbf16>
    %c0_4 = arith.constant 0 : index
    %c0_5 = arith.constant 0 : index
    %5 = vector.load %arg4[%c0_4, %c0_5] : memref<128x128xbf16, #tpu.memory_space<vmem>>, vector<128x128xbf16>
    %cst = arith.constant dense<0.000000e+00> : vector<8x128xf32>
    %6 = tpu.matmul %4, %5, %cst {dimension_numbers = #tpu.dot_dimension_numbers<[1], [0], [0], [1], [0, 0, 1, 1], [], []>} : vector<8x128xbf16>, vector<128x128xbf16>, vector<8x128xf32> -> vector<8x128xf32>
    %7 = arith.addf %3, %6 : vector<8x128xf32>
    %c0_6 = arith.constant 0 : index
    %c0_7 = arith.constant 0 : index
    %8 = vector.load %arg6[%c0_6, %c0_7] : memref<8x128xf32, #tpu.memory_space<vmem>>, vector<8x128xf32>
    tpu.vector_store %arg6[%c0_6, %c0_7], %7 {strides = array<i32>} : memref<8x128xf32, #tpu.memory_space<vmem>>, vector<8x128xf32>,
    %c0_8 = arith.constant 0 : index
    %c0_9 = arith.constant 0 : index
    %9 = vector.load %arg7[%c0_8, %c0_9] : memref<8x128xf32, #tpu.memory_space<vmem>>, vector<8x128xf32>
    %c0_10 = arith.constant 0 : index
    %c0_11 = arith.constant 0 : index
    %10 = vector.load %arg3[%c0_10, %c0_11] : memref<8x128xbf16, #tpu.memory_space<vmem>>, vector<8x128xbf16>
    %c0_12 = arith.constant 0 : index
    %c0_13 = arith.constant 0 : index
    %11 = vector.load %arg4[%c0_12, %c0_13] : memref<128x128xbf16, #tpu.memory_space<vmem>>, vector<128x128xbf16>
    %cst_14 = arith.constant dense<0.000000e+00> : vector<8x128xf32>
    %12 = tpu.matmul %10, %11, %cst_14 {dimension_numbers = #tpu.dot_dimension_numbers<[1], [0], [0], [1], [0, 0, 1, 1], [], []>} : vector<8x128xbf16>, vector<128x128xbf16>, vector<8x128xf32> -> vector<8x128xf32>
    %13 = arith.addf %9, %12 : vector<8x128xf32>
    %c0_15 = arith.constant 0 : index
    %c0_16 = arith.constant 0 : index
    %14 = vector.load %arg7[%c0_15, %c0_16] : memref<8x128xf32, #tpu.memory_space<vmem>>, vector<8x128xf32>
    tpu.vector_store %arg7[%c0_15, %c0_16], %13 {strides = array<i32>} : memref<8x128xf32, #tpu.memory_space<vmem>>, vector<8x128xf32>,
    %c1_i32 = arith.constant 1 : i32
    %15 = arith.cmpi eq, %arg1, %c1_i32 : i32
    %16 = arith.extui %15 : i1 to i32
    %c0_i32_17 = arith.constant 0 : i32
    %17 = arith.cmpi ne, %16, %c0_i32_17 : i32
    scf.if %17 {
      %c0_18 = arith.constant 0 : index
      %c0_19 = arith.constant 0 : index
      %18 = vector.load %arg6[%c0_18, %c0_19] : memref<8x128xf32, #tpu.memory_space<vmem>>, vector<8x128xf32>
      %c0_20 = arith.constant 0 : index
      %c0_21 = arith.constant 0 : index
      %19 = vector.load %arg5[%c0_20, %c0_21] : memref<1x128xf32, #tpu.memory_space<vmem>>, vector<1x128xf32>
      %20 = vector.broadcast %19 : vector<1x128xf32> to vector<8x128xf32>
      %21 = arith.addf %18, %20 : vector<8x128xf32>
      %c0_22 = arith.constant 0 : index
      %c0_23 = arith.constant 0 : index
      %22 = vector.load %arg6[%c0_22, %c0_23] : memref<8x128xf32, #tpu.memory_space<vmem>>, vector<8x128xf32>
      tpu.vector_store %arg6[%c0_22, %c0_23], %21 {strides = array<i32>} : memref<8x128xf32, #tpu.memory_space<vmem>>, vector<8x128xf32>,
      %c0_24 = arith.constant 0 : index
      %c0_25 = arith.constant 0 : index
      %23 = vector.load %arg7[%c0_24, %c0_25] : memref<8x128xf32, #tpu.memory_space<vmem>>, vector<8x128xf32>
      %c0_26 = arith.constant 0 : index
      %c0_27 = arith.constant 0 : index
      %24 = vector.load %arg5[%c0_26, %c0_27] : memref<1x128xf32, #tpu.memory_space<vmem>>, vector<1x128xf32>
      %25 = vector.broadcast %24 : vector<1x128xf32> to vector<8x128xf32>
      %26 = arith.addf %23, %25 : vector<8x128xf32>
      %c0_28 = arith.constant 0 : index
      %c0_29 = arith.constant 0 : index
      %27 = vector.load %arg7[%c0_28, %c0_29] : memref<8x128xf32, #tpu.memory_space<vmem>>, vector<8x128xf32>
      tpu.vector_store %arg7[%c0_28, %c0_29], %26 {strides = array<i32>} : memref<8x128xf32, #tpu.memory_space<vmem>>, vector<8x128xf32>,
    } else {
    }
    return
  }
  func.func @transform_0(%arg0: i32, %arg1: i32) -> (i32, i32) {
    %c0_i32 = arith.constant 0 : i32
    %c0_i32_0 = arith.constant 0 : i32
    return %c0_i32, %arg1 : i32, i32
  }
  func.func @transform_1(%arg0: i32, %arg1: i32) -> (i32, i32) {
    %c0_i32 = arith.constant 0 : i32
    %c0_i32_0 = arith.constant 0 : i32
    return %c0_i32, %arg1 : i32, i32
  }
  func.func @transform_2(%arg0: i32, %arg1: i32) -> (i32, i32) {
    %c0_i32 = arith.constant 0 : i32
    return %arg1, %arg0 : i32, i32
  }
  func.func @transform_3(%arg0: i32, %arg1: i32) -> (i32, i32) {
    %c0_i32 = arith.constant 0 : i32
    %c0_i32_0 = arith.constant 0 : i32
    return %c0_i32, %arg0 : i32, i32
  }
  func.func @transform_4(%arg0: i32, %arg1: i32) -> (i32, i32) {
    %c0_i32 = arith.constant 0 : i32
    %c0_i32_0 = arith.constant 0 : i32
    return %c0_i32, %arg0 : i32, i32
  }
  func.func @transform_5(%arg0: i32, %arg1: i32) -> (i32, i32) {
    %c0_i32 = arith.constant 0 : i32
    %c0_i32_0 = arith.constant 0 : i32
    return %c0_i32, %arg0 : i32, i32
  }
}

</mosaic_0001>

<bundles_post_ra>
// kernel: tpu_custom_call.1
= control target key start
LH: loop header
LB: loop body
LE: loop exit
PB: predicated region body
PF: predicated region fallthrough
CT: control target
= control target key end

     0   :  { %s1473_s0 = inlined_call_operand.hbm [shape: bf16[8,256], index: 0, kind: input, shape index: {}]   ;;  %s1474_s1 = inlined_call_operand.hbm [shape: bf16[8,256], index: 1, kind: input, shape index: {}]   ;;  %s1475_s2 = inlined_call_operand.hbm [shape: bf16[256,128], index: 2, kind: input, shape index: {}]   ;;  %s1476_s3 = inlined_call_operand.vmem [shape: f32[1,128], index: 3, kind: input, shape index: {}]   ;;  %s1477_s4 = inlined_call_operand.hbm [shape: f32[8,128], index: 4, kind: output, shape index: {0}]   ;;  %s1478_s5 = inlined_call_operand.hbm [shape: f32[8,128], index: 5, kind: output, shape index: {1}]  }
   0x1   :  { %1481 = sst [smem:[#allocation16_spill]] %s1474_s1 }
   0x2   :  { %11 = vsyncpa [#allocation3], 0 }
   0x3   :  { %13 = vsyncpa [#allocation3 + $0x1], 0 }
   0x4   :  { %14 = vsyncpa [#allocation6], 0 }
   0x5   :  { %16 = vsyncpa [#allocation6 + $0x1], 0 }
   0x6   :  { %17 = vsyncpa [#allocation4], 0 }
   0x7   :  { %18 = vsyncpa [#allocation10], 0  ;;  %s1187_s18 = smov 0   ;;  %s1189_s19 = smov 0  }
   0x8   :  { %s1191_s20 = smov 0   ;;  %s1193_s21 = smov 0  }
   0x9   :  { %s1195_s22 = smov 0   ;;  %s1197_s23 = smov 0  }
   0xa LB: > { %s1216_s24 = sadd.s32 4294967295, %s1145_s23   ;;  %s33_s25 = sadd.s32 1, %s1141_s22  ;;  %s1145_s23 = sphi %s1197_s23, %s24_s23   ;;  %s1141_s22 = sphi %s1195_s22, %s1495_s22   ;;  %s1137_s21 = sphi %s1193_s21, %s1494_s21   ;;  %s1133_s20 = sphi %s1191_s20, %s1493_s20   ;;  %s1129_s19 = sphi %s1189_s19, %s1492_s19   ;;  %s1125_s18 = sphi %s1187_s18, %s1491_s18  }
   0xb   : > { %p34_p0 = scmp.ge.s32.totalorder %s33_s25, 2  ;;  %s43_s26 = sadd.s32 1, %s1133_s20 }
   0xc   : > { %p50_p1 = scmp.ne.s32.totalorder %s1133_s20, %s1129_s19  ;;  %p51_p2 = scmp.eq.s32.totalorder %s1145_s23, 0 }
   0xd   : > { %s1497_s25 = smov (%p34_p0, %s33_s25), 0  ;;  %p56_p4 = scmp.ne.s32.totalorder %s1129_s19, %s1125_s18 }
   0xe   : > { %1482 = sst [smem:[#allocation15_spill]] %s1497_s25  ;;  %p52_p3 = por %p51_p2, %p50_p1 }
   0xf   : > { %s40_s27 = ssub.s32 %s1141_s22, %s1497_s25  ;;  %p57_p5 = scmp.eq.s32.totalorder %s1216_s24, 0 }
  0x10   : > { %p41_p6 = scmp.eq.s32.totalorder %s40_s27, 0  ;;  %p865_p8 = scmp.lt.s32.totalorder %s1145_s23, 2 }
  0x11   : > { %p1229_p7 = por %p57_p5, %p56_p4  ;;  %s1238_s30 = sand.u32 1, %s1133_s20  }
  0x12   : > { %s1235_s29 = scalar_select %p41_p6, %s1133_s20, %s43_s26  }
  0x13   : > { %s1483_s28 = scalar_select %p1229_p7, 1, 0 }
  0x14   : > { %s746_s6 = sshll.u32 %s1141_s22, 6  ;;  %s745_s7 = sshll.u32 %s1238_s30, 2 }
  0x15   : > { %p1242_p9 = pnand %p865_p8, %p52_p3  ;;  %s236_s9 = sand.u32 1, %s1145_s23  }
  0x16   : > { %s1485_s1 = sld [smem:[#allocation16_spill]]  ;;  %s240_s13 = scalar_lea.vmem [#allocation5], %s745_s7 }
  0x17   : > { %s247_s14 = sshll.u32 %s240_s13, 4  ;;  %s749_s15 = sshll.u32 %s1238_s30, 6  ;;  %s1256_s14 = int_to_ptr.vmem [resolvable:$true] %s247_s14 }
  0x18   : > { %s1259_s16 = scalar_lea.sflag [#allocation6], %s236_s9  ;;  %p1265_p11 = pneg %p1242_p9 }
  0x1c   : > { %s1252_s12 = scalar_lea.hbm %s1485_s1, %s746_s6  ;;  %s946_s10 = scalar_lea.hbm %s1485_s1, 128 }
  0x1d   : > { %s941_s17 = scalar_lea.hbm %s1252_s12, 64  ;;  %p947_p0 = scmp.lt.u32.totalorder %s1252_s12, %s1485_s1 }
  0x1e   : > { %p942_p10 = scmp.ne.s32.totalorder %s1252_s12, %s941_s17  ;;  %p948_p1 = scmp.lt.u32.totalorder %s946_s10, %s941_s17 }
  0x1f   : > { %p950_p3 = scmp.lt.u32.totalorder %s941_s17, %s1252_s12 }
  0x20   : > { %p944_p12 = pnand %p1265_p11, %p942_p10  ;;  %p949_p2 = por %p948_p1, %p947_p0 }
  0x22   : > { %p945_p13 = pneg %p944_p12  ;;  %p951_p4 = por %p950_p3, %p949_p2 }
  0x24   : > { %p952_p5 = pnand %p951_p4, %p945_p13 }
  0x26   : > { %955 = shalt.err (!%p952_p5)
}
  0x27   : > { %s956_s9 = scalar_lea.vmem %s1256_s14, 64  ;;  %s1147_s26 = smov [#allocation5]  }
  0x28   : > { %p957_p6 = scmp.ne.s32.totalorder %s1256_s14, %s956_s9  ;;  %s961_s27 = sshll.u32 %s1147_s26, 4  ;;  %s962_s27 = int_to_ptr.vmem [resolvable:$false] %s961_s27 }
  0x29   : > { %s963_s11 = scalar_lea.vmem %s962_s27, 128  ;;  %p964_p12 = scmp.lt.s32.totalorder %s1256_s14, %s962_s27 }
  0x2a   : > { %p959_p8 = pnand %p957_p6, %p1265_p11  ;;  %p965_p7 = scmp.lt.s32.totalorder %s963_s11, %s956_s9 }
  0x2c   : > { %p960_p10 = pneg %p959_p8  ;;  %p966_p0 = por %p965_p7, %p964_p12 }
  0x2e   : > { %p967_p1 = pnand %p966_p0, %p960_p10 }
  0x30   : > { %970 = shalt.err (!%p967_p1)
}
  0x31   : > { %861 = dma.hbm_to_vmem [thread:$0]  (!%p1242_p9), %s1252_s12, 64, %s1256_s14, %s1259_s16  }
  0x32   : > { %p752_p13 = scmp.ge.s32.totalorder %s1145_s23, 1  ;;  %s258_s17 = scalar_lea.vmem [#allocation7], %s749_s15 }
  0x33   : > { %s266_s10 = sshll.u32 %s258_s17, 4  ;;  %p274_p7 = scmp.lt.s32.totalorder %s1145_s23, 3  ;;  %s1293_s10 = int_to_ptr.vmem [resolvable:$true] %s266_s10 }
  0x34   : > { %s1304_s27 = scalar_lea.hbm %s1473_s0, %s746_s6  ;;  %s222_s12 = scalar_lea.vmem [#allocation2], %s745_s7 }
  0x35   : > { %p1295_p2 = pnand %p752_p13, %p274_p7  ;;  %s229_s14 = sshll.u32 %s222_s12, 4  ;;  %s1308_s14 = int_to_ptr.vmem [resolvable:$true] %s229_s14 }
  0x36   : > { %s782_s15 = sshll.u32 %s1141_s22, 10  ;;  %s219_s11 = scalar_lea.sflag [#allocation3], %s1238_s30 }
  0x37   : > { %s1487_s13 = scalar_select %p1295_p2, 1, 0 }
  0x38   : > { %s971_s17 = scalar_lea.hbm %s1304_s27, 64  ;;  %s976_s6 = scalar_lea.hbm %s1473_s0, 128 }
  0x39   : > { %p972_p3 = scmp.ne.s32.totalorder %s1304_s27, %s971_s17  ;;  %p977_p6 = scmp.lt.u32.totalorder %s1304_s27, %s1473_s0 }
  0x3a   : > { %p978_p8 = scmp.lt.u32.totalorder %s976_s6, %s971_s17  ;;  %p980_p12 = scmp.lt.u32.totalorder %s971_s17, %s1304_s27 }
  0x3b   : > { %p974_p4 = pnand %p972_p3, %p1265_p11 }
  0x3c   : > { %p979_p10 = por %p978_p8, %p977_p6 }
  0x3d   : > { %p975_p5 = pneg %p974_p4 }
  0x3e   : > { %p981_p0 = por %p980_p12, %p979_p10 }
  0x40   : > { %p982_p1 = pnand %p981_p0, %p975_p5 }
  0x42   : > { %985 = shalt.err (!%p982_p1)
}
  0x43   : > { %s986_s30 = scalar_lea.vmem %s1308_s14, 64  ;;  %s1148_s1 = smov [#allocation2]  }
  0x44   : > { %p987_p13 = scmp.ne.s32.totalorder %s1308_s14, %s986_s30  ;;  %s991_s7 = sshll.u32 %s1148_s1, 4  ;;  %s992_s7 = int_to_ptr.vmem [resolvable:$false] %s991_s7 }
  0x45   : > { %s993_s25 = scalar_lea.vmem %s992_s7, 128  ;;  %p994_p4 = scmp.lt.s32.totalorder %s1308_s14, %s992_s7 }
  0x46   : > { %p989_p7 = pnand %p987_p13, %p1265_p11  ;;  %p995_p2 = scmp.lt.s32.totalorder %s993_s25, %s986_s30 }
  0x48   : > { %p990_p3 = pneg %p989_p7  ;;  %p996_p6 = por %p995_p2, %p994_p4 }
  0x4a   : > { %p997_p8 = pnand %p996_p6, %p990_p3 }
  0x4c   : > { %1000 = shalt.err (!%p997_p8)
}
  0x4d   : > { %858 = dma.hbm_to_vmem [thread:$0]  (!%p1242_p9), %s1304_s27, 64, %s1308_s14, %s219_s11  }
  0x4e   : > { %s1338_s9 = scalar_lea.hbm %s1475_s2, %s782_s15  ;;  %s1006_s1 = scalar_lea.hbm %s1475_s2, 2048 }
  0x4f   : > { %s1001_s6 = scalar_lea.hbm %s1338_s9, 1024  ;;  %p1007_p12 = scmp.lt.u32.totalorder %s1338_s9, %s1475_s2 }
  0x50   : > { %p1002_p2 = scmp.ne.s32.totalorder %s1338_s9, %s1001_s6  ;;  %p1008_p0 = scmp.lt.u32.totalorder %s1006_s1, %s1001_s6 }
  0x51   : > { %p1010_p13 = scmp.lt.u32.totalorder %s1001_s6, %s1338_s9 }
  0x52   : > { %p1004_p5 = pnand %p1002_p2, %p1265_p11  ;;  %p1009_p1 = por %p1008_p0, %p1007_p12 }
  0x54   : > { %p1005_p10 = pneg %p1004_p5  ;;  %p1011_p7 = por %p1010_p13, %p1009_p1 }
  0x56   : > { %p1012_p3 = pnand %p1011_p7, %p1005_p10 }
  0x58   : > { %1015 = shalt.err (!%p1012_p3)
}
  0x59   : > { %s1016_s15 = scalar_lea.vmem %s1293_s10, 1024  ;;  %s1149_s11 = smov [#allocation7]  }
  0x5a   : > { %p1017_p4 = scmp.ne.s32.totalorder %s1293_s10, %s1016_s15  ;;  %s1021_s7 = sshll.u32 %s1149_s11, 4  ;;  %s1022_s7 = int_to_ptr.vmem [resolvable:$false] %s1021_s7 }
  0x5b   : > { %s1023_s25 = scalar_lea.vmem %s1022_s7, 2048  ;;  %p1024_p2 = scmp.lt.s32.totalorder %s1293_s10, %s1022_s7 }
  0x5c   : > { %p1019_p6 = pnand %p1017_p4, %p1265_p11  ;;  %p1025_p5 = scmp.lt.s32.totalorder %s1023_s25, %s1016_s15 }
  0x5e   : > { %p1020_p8 = pneg %p1019_p6  ;;  %p1026_p12 = por %p1025_p5, %p1024_p2 }
  0x60   : > { %p1027_p0 = pnand %p1026_p12, %p1020_p8 }
  0x62   : > { %1030 = shalt.err (!%p1027_p0)
}
  0x63   : > { %s1150_s12 = smov 64   ;;  %s1151_s17 = smov 4  }
  0x64   : > { %864 = dma.hbm_to_vmem [thread:$0]  (!%p1242_p9), %s1338_s9, 1024, %s1293_s10, %s1259_s16, %s1150_s12, %s1150_s12, %s1151_s17  }
  0x65   : > { %p1488_p11 = scmp.ne.s32.totalorder %s1487_s13, 0 }
  0x66   : > { %s280_s18 = sand.u32 (!%p1488_p11), 1, %s1129_s19   ;;  %p1489_p10 = scmp.ne.s32.totalorder (!%p1488_p11), %s1483_s28, 0 }
  0x67   : > { %278 = sbr.rel (%p1488_p11) target bundleno = 430 (0x1ae), region = 36  ;;  %s753_s6 = sshll.u32 (!%p1488_p11), %s280_s18, 2 }
  0x68   : > { %s281_s26 = scalar_lea.sflag (!%p1488_p11), [#allocation3], %s280_s18  ;;  %s1365_s30 = scalar_lea.vmem (!%p1488_p11), [#allocation2], %s753_s6 }
  0x6e   : > { %1108 = dma.done.wait (%p1489_p10), %s281_s26, 64  }
  0x6f   : > { %1110 = vsyncadd (%p1489_p10), %s281_s26, 4294967232  ;;  %s289_s1 = sand.u32 1, %s1216_s24   ;;  %s1372_s16 = scalar_lea.vmem [#allocation5], %s753_s6 }
  0x70   : > { %s290_s8 = scalar_lea.sflag [#allocation6], %s289_s1 }
  0x71   : > { %1112 = dma.done.wait (%p1489_p10), %s290_s8, 1088  }
  0x72   : > { %1114 = vsyncadd (%p1489_p10), %s290_s8, 4294966208  ;;  %s755_s10 = sshll.u32 %s280_s18, 6  ;;  %p756_p9 = scmp.ne.s32.totalorder %s1137_s21, 0 }
  0x73   : > { %s1378_s13 = scalar_lea.vmem [#allocation7], %s755_s10  ;;  %v1152_v0 = vmov (!%p756_p9), 0.0  }
  0x74   : > { %345 = sbr.rel (%p756_p9) target bundleno = 123 (0x7b), region = 52  ;;  %346 = vst [vmem:[#allocation8] sm:$0xff] (!%p756_p9), %v1152_v0  ;;  %347 = vst [vmem:[#allocation9] sm:$0xff] (!%p756_p9), %v1152_v0 }
  0x7b PF: > { %v925_v1 = vld [vmem:[%s1378_s13] sm:$0xff]   ;;  %v1153_v2 = vmov 0.0   ;;  %v927_v4 = vld [vmem:[%s1378_s13 + $0x8] sm:$0xff]   ;;  %vm1154_vm0 = vmmov 0   ;;  %v929_v6 = vld [vmem:[%s1378_s13 + $0x10] sm:$0xff]   ;;  %p773_p1 = scmp.ne.s32.totalorder %s1137_s21, 1 }
  0x7c   : > { %801 = vmatprep.subr.bf16.mxu0 %v1153_v2  ;;  %821 = vmatprep.subr.bf16.mxu1 %v1153_v2  ;;  %v926_v3 = vld [vmem:[%s1378_s13] sm:$0xff]   ;;  %v928_v5 = vld [vmem:[%s1378_s13 + $0x8] sm:$0xff]   ;;  %v930_v7 = vld [vmem:[%s1378_s13 + $0x10] sm:$0xff]  }
  0x7d   : > { %802 = vmatpush3.bf16.msra.mxu0 %v925_v1  ;;  %817 = vmatprep.mubr.msk.bf16.mxu0 %vm1154_vm0, %v1153_v2  ;;  %v931_v8 = vld [vmem:[%s1378_s13 + $0x18] sm:$0xff]   ;;  %v933_v10 = vld [vmem:[%s1378_s13 + $0x20] sm:$0xff]   ;;  %v935_v12 = vld [vmem:[%s1378_s13 + $0x28] sm:$0xff]  }
  0x7e   : > { %822 = vmatpush3.bf16.msra.mxu1 %v926_v3  ;;  %803 = vmatprep.subr.bf16.mxu0 %v1153_v2  ;;  %v932_v9 = vld [vmem:[%s1378_s13 + $0x18] sm:$0xff]   ;;  %v934_v11 = vld [vmem:[%s1378_s13 + $0x20] sm:$0xff]   ;;  %v936_v13 = vld [vmem:[%s1378_s13 + $0x28] sm:$0xff]  }
  0x7f   : > { %823 = vmatprep.subr.bf16.mxu1 %v1153_v2  ;;  %837 = vmatprep.mubr.msk.bf16.mxu1 %vm1154_vm0, %v1153_v2  ;;  %v937_v14 = vld [vmem:[%s1378_s13 + $0x30] sm:$0xff]   ;;  %v939_v16 = vld [vmem:[%s1378_s13 + $0x38] sm:$0xff]   ;;  %v348_v20 = vld [vmem:[#allocation8] sm:$0xff] }
  0x80   : > { %v938_v15 = vld [vmem:[%s1378_s13 + $0x30] sm:$0xff]   ;;  %v940_v17 = vld [vmem:[%s1378_s13 + $0x38] sm:$0xff]   ;;  %v456_v21 = vld [vmem:[#allocation9] sm:$0xff] }
  0x81   : > { %804 = vmatpush3.bf16.msra.mxu0 %v927_v4  ;;  %v349_v18 = vld [vmem:[%s1365_s30] sm:$0xf]  ;;  %v457_v19 = vld [vmem:[%s1372_s16] sm:$0xf] }
  0x82   : > { %824 = vmatpush3.bf16.msra.mxu1 %v928_v5  ;;  %805 = vmatprep.subr.bf16.mxu0 %v1153_v2  ;;  %v774_v33 = vld [vmem:[%s1476_s3] ss:$0 sm:$0xff] (!%p773_p1) }
  0x83   : > { %825 = vmatprep.subr.bf16.mxu1 %v1153_v2 }
  0x85   : > { %806 = vmatpush3.bf16.msra.mxu0 %v929_v6 }
  0x86   : > { %826 = vmatpush3.bf16.msra.mxu1 %v930_v7  ;;  %807 = vmatprep.subr.bf16.mxu0 %v1153_v2 }
  0x87   : > { %827 = vmatprep.subr.bf16.mxu1 %v1153_v2 }
  0x89   : > { %808 = vmatpush3.bf16.msra.mxu0 %v931_v8 }
  0x8a   : > { %828 = vmatpush3.bf16.msra.mxu1 %v932_v9  ;;  %809 = vmatprep.subr.bf16.mxu0 %v1153_v2 }
  0x8b   : > { %829 = vmatprep.subr.bf16.mxu1 %v1153_v2 }
  0x8d   : > { %810 = vmatpush3.bf16.msra.mxu0 %v933_v10 }
  0x8e   : > { %830 = vmatpush3.bf16.msra.mxu1 %v934_v11  ;;  %811 = vmatprep.subr.bf16.mxu0 %v1153_v2 }
  0x8f   : > { %831 = vmatprep.subr.bf16.mxu1 %v1153_v2 }
  0x91   : > { %812 = vmatpush3.bf16.msra.mxu0 %v935_v12 }
  0x92   : > { %832 = vmatpush3.bf16.msra.mxu1 %v936_v13  ;;  %813 = vmatprep.subr.bf16.mxu0 %v1153_v2 }
  0x93   : > { %833 = vmatprep.subr.bf16.mxu1 %v1153_v2 }
  0x95   : > { %814 = vmatpush3.bf16.msra.mxu0 %v937_v14 }
  0x96   : > { %834 = vmatpush3.bf16.msra.mxu1 %v938_v15  ;;  %815 = vmatprep.subr.bf16.mxu0 %v1153_v2 }
  0x97   : > { %835 = vmatprep.subr.bf16.mxu1 %v1153_v2 }
  0x99   : > { %816 = vmatpush3.bf16.msra.mxu0 %v939_v16 }
  0x9a   : > { %836 = vmatpush3.bf16.msra.mxu1 %v940_v17 }
  0x9c   : > { %818 = vmatmul.mubr.bf16.vlgmr.msra.gmra.mrb[0].mxu0 %v349_v18 }
  0x9d   : > { %838 = vmatmul.mubr.bf16.vlgmr.msra.gmra.mrb[0].mxu1 %v457_v19 }
 0x16d   : > { %567 = sbr.rel (%p773_p1) target bundleno = 382 (0x17e), region = 56 }
 0x16f   : > { %v448_v22 = vpop.f32.mrb[0].mxu0 }
 0x170   : > { %v454_v23 = vadd.f32 %v448_v22, %v348_v20  ;;  %v556_v24 = vpop.f32.mrb[0].mxu1  ;;  %v819_v25 = vpop.f32.mrb[1].mxu0 }
 0x171   : > { %v562_v26 = vadd.f32 %v556_v24, %v456_v21  ;;  %v839_v27 = vpop.f32.mrb[1].mxu1  ;;  %v451_v28 = vpop.f32.mrb[2].mxu0 }
 0x172   : > { %455 = vst [vmem:[#allocation8] sm:$0xff] %v454_v23  ;;  %v559_v29 = vpop.f32.mrb[2].mxu1  ;;  %v820_v30 = vpop.f32.mrb[3].mxu0 }
 0x173   : > { %563 = vst [vmem:[#allocation9] sm:$0xff] %v562_v26  ;;  %v840_v31 = vpop.f32.mrb[3].mxu1 }
 0x179   : > { %v568_v32 = vld [vmem:[#allocation8] sm:$0xff] }
 0x17a   : > { %v578_v34 = vld [vmem:[#allocation9] sm:$0xff]  ;;  %v576_v35 = vadd.f32 %v774_v33, %v568_v32 }
 0x17b   : > { %v586_v36 = vadd.f32 %v774_v33, %v578_v34 }
 0x17c   : > { %577 = vst [vmem:[#allocation8] sm:$0xff] %v576_v35 }
 0x17d   : > { %587 = vst [vmem:[#allocation9] sm:$0xff] %v586_v36 }
 0x17e PF: > { %p866_p13 = scmp.eq.s32.totalorder %s1216_s24, 1  ;;  %s1155_s27 = smov [#allocation8]  }
 0x17f   : > { %s597_s14 = sshll.u32 %s1155_s27, 4  ;;  %s1156_s15 = smov [#allocation9]   ;;  %s598_s14 = int_to_ptr.vmem [resolvable:$true] %s597_s14 }
 0x180   : > { %s610_s11 = sshll.u32 %s1156_s15, 4  ;;  %s1031_s21 = scalar_lea.vmem %s598_s14, 128  ;;  %s1404_s11 = int_to_ptr.vmem [resolvable:$true] %s610_s11 }
 0x181   : > { %p1032_p7 = scmp.ne.s32.totalorder %s598_s14, %s1031_s21  ;;  %p1038_p6 = scmp.lt.s32.totalorder %s598_s14, %s598_s14 }
 0x182   : > { %p1039_p8 = scmp.lt.s32.totalorder %s1031_s21, %s1031_s21 }
 0x183   : > { %p1033_p3 = pnand %p1032_p7, %p866_p13 }
 0x184   : > { %p1040_p2 = por %p1039_p8, %p1038_p6 }
 0x185   : > { %p1034_p4 = pneg %p1033_p3 }
 0x187   : > { %p1041_p5 = pnand %p1040_p2, %p1034_p4 }
 0x189   : > { %1044 = shalt.err (!%p1041_p5)
}
 0x18a   : > { %s1045_s12 = scalar_lea.hbm %s1477_s4, 128 }
 0x18b   : > { %p1046_p12 = scmp.ne.s32.totalorder %s1477_s4, %s1045_s12  ;;  %p1051_p10 = scmp.lt.u32.totalorder %s1045_s12, %s1477_s4 }
 0x18d   : > { %p1047_p0 = pnand %p1046_p12, %p866_p13 }
 0x18f   : > { %p1048_p11 = pneg %p1047_p0 }
 0x191   : > { %p1053_p9 = pnand %p1051_p10, %p1048_p11 }
 0x193   : > { %1056 = shalt.err (!%p1053_p9)
}
 0x194   : > { %848 = dma.vmem_to_hbm [thread:$0]  (%p866_p13), %s598_s14, 128, %s1477_s4, [#allocation4]  }
 0x195   : > { %s1057_s8 = scalar_lea.vmem %s1404_s11, 128  ;;  %p1064_p4 = scmp.lt.s32.totalorder %s1404_s11, %s1404_s11 }
 0x196   : > { %p1058_p1 = scmp.ne.s32.totalorder %s1404_s11, %s1057_s8  ;;  %p1065_p6 = scmp.lt.s32.totalorder %s1057_s8, %s1057_s8 }
 0x198   : > { %p1059_p7 = pnand %p1058_p1, %p866_p13  ;;  %p1066_p8 = por %p1065_p6, %p1064_p4 }
 0x19a   : > { %p1060_p3 = pneg %p1059_p7 }
 0x19c   : > { %p1067_p2 = pnand %p1066_p8, %p1060_p3 }
 0x19e   : > { %1070 = shalt.err (!%p1067_p2)
}
 0x19f   : > { %s1071_s13 = scalar_lea.hbm %s1478_s5, 128 }
 0x1a0   : > { %p1072_p5 = scmp.ne.s32.totalorder %s1478_s5, %s1071_s13  ;;  %p1077_p11 = scmp.lt.u32.totalorder %s1071_s13, %s1478_s5 }
 0x1a2   : > { %p1073_p12 = pnand %p1072_p5, %p866_p13 }
 0x1a4   : > { %p1074_p0 = pneg %p1073_p12 }
 0x1a6   : > { %p1079_p10 = pnand %p1077_p11, %p1074_p0 }
 0x1a8   : > { %1082 = shalt.err (!%p1079_p10)
}
 0x1a9   : > { %850 = dma.vmem_to_hbm [thread:$0]  (%p866_p13), %s1404_s11, 128, %s1478_s5, [#allocation10]  }
 0x1aa   : > { %1116 = dma.done.wait (%p866_p13), [#allocation4], 128  }
 0x1ab   : > { %1118 = vsyncadd (%p866_p13), [#allocation4], 4294967168 }
 0x1ac   : > { %1120 = dma.done.wait (%p866_p13), [#allocation10], 128  }
 0x1ad   : > { %1122 = vsyncadd (%p866_p13), [#allocation10], 4294967168 }
 0x1ae PF: > { %s24_s23 = sadd.s32 1, %s1145_s23   ;;  %s1490_s11 = sld [smem:[#allocation15_spill]] }
 0x1af   : > { %p21_p9 = scmp.ge.s32.totalorder %s24_s23, 4   ;;  %s1491_s18 = smov %s1129_s19 }
 0x1b0   : > { %s1492_s19 = smov %s1133_s20  ;;  %s1493_s20 = smov %s1235_s29 }
 0x1b1   : > { %s1494_s21 = smov %s1141_s22  ;;  %23 = sbr.rel (!%p21_p9) target bundleno = 10 (0xa), region = 118 }
 0x1b4   : > { %s1495_s22 = smov %s1490_s11 }
 0x1b8   :  { %627 = vsyncpa [#allocation3], 1 }
 0x1b9   :  { %629 = vsyncpa [#allocation3 + $0x1], 1 }
 0x1ba   :  { %630 = vsyncpa [#allocation6], 1 }
 0x1bb   :  { %632 = vsyncpa [#allocation6 + $0x1], 1 }
 0x1bc   :  { %633 = vsyncpa [#allocation4], 1 }
 0x1bd   :  { %635 = vsyncpa [#allocation4 + $0x1], 1 }
 0x1be   :  { %636 = vsyncpa [#allocation10], 1 }

</bundles_post_ra>
